<compile_context>
chip_gen: v7x
topology: tpu7x:2x2x1
jax: 0.10.0
libtpu: 0.0.40
codegen_flags: <defaults>
</compile_context>

<pallas_src>
import math

import jax
import jax.numpy as jnp
from jax.experimental import pallas as pl
from jax.experimental.pallas import tpu as pltpu


def _silu(x):
    # x arrives in f32 (matmul accumulator dtype); keep the exp on the EUP in f32.
    return x * jax.nn.sigmoid(x)


def mlp_node_kernel(x_ref, w0_ref, w1_ref, w2_ref, o_ref):
    # x_ref : (D_in, TILE_N)    feature-major tile of node features
    # w*_ref: (fan_out, fan_in) pre-scaled, pre-transposed weights (VMEM-resident)
    # o_ref : (D_out, TILE_N)   lane-dense output tile
    x = x_ref[...]

    h = jnp.dot(w0_ref[...], x, preferred_element_type=jnp.float32)
    h = _silu(h)

    h = jnp.dot(w1_ref[...], h.astype(w1_ref.dtype),
                preferred_element_type=jnp.float32)
    h = _silu(h)

    y = jnp.dot(w2_ref[...], h.astype(w2_ref.dtype),
                preferred_element_type=jnp.float32)
    o_ref[...] = y.astype(o_ref.dtype)


def _pick_tile_n(n, requested):
    """Largest multiple of 128 <= requested that divides n; keep grid >= 2."""
    requested = max(1, min(requested, n))
    if n % 256 == 0:
        # Keep at least 2 grid steps so both v7x TensorCores get work.
        requested = min(requested, max(128, n // 2))
    t = requested - requested % 128
    while t >= 128:
        if n % t == 0:
            return t
        t -= 128
    # Fall back to one full-width block (block dim == full array dim is legal).
    return n


def mlp_node_forward(node_features, w0, w1, w2, *, tile_n=1024,
                     stream_bf16=False):
    """Pallas implementation of MLPNode.forward for node_type == 'mlp'."""
    n, d_in = node_features.shape
    h0 = w0.shape[1]
    h1 = w1.shape[1]
    d_out = w2.shape[1]

    # Fold the o3.Linear 1/sqrt(fan_in) path normalization into the weights
    # (one-time wrapper cost; removes three full-tile VPU multiplies per grid
    # step) and pre-transpose to [fan_out, fan_in] for feature-major matmuls.
    w0t = (w0 * (1.0 / math.sqrt(d_in))).T   # [H0, D_in]
    w1t = (w1 * (1.0 / math.sqrt(h0))).T     # [H1, H0]
    w2t = (w2 * (1.0 / math.sqrt(h1))).T     # [D_out, H1]

    # Feature-major activations: nodes on the lane axis.
    x_t = node_features.T                    # [D_in, N]

    if stream_bf16:
        # Halve the dominant HBM stream; matmuls still accumulate in f32 and
        # the SiLU stays in f32 inside the kernel.
        x_t = x_t.astype(jnp.bfloat16)
        w0t = w0t.astype(jnp.bfloat16)
        w1t = w1t.astype(jnp.bfloat16)
        w2t = w2t.astype(jnp.bfloat16)

    tile = _pick_tile_n(n, tile_n)
    grid = (n // tile,)

    out_t = pl.pallas_call(
        mlp_node_kernel,
        out_shape=jax.ShapeDtypeStruct((d_out, n), jnp.float32),
        grid_spec=pltpu.PrefetchScalarGridSpec(
            num_scalar_prefetch=0,
            grid=grid,
            in_specs=[
                pl.BlockSpec((d_in, tile), lambda i: (0, i)),
                # Weights: constant block index -> resident across the grid.
                pl.BlockSpec((h0, d_in), lambda i: (0, 0)),
                pl.BlockSpec((h1, h0), lambda i: (0, 0)),
                pl.BlockSpec((d_out, h1), lambda i: (0, 0)),
            ],
            out_specs=pl.BlockSpec((d_out, tile), lambda i: (0, i)),
        ),
        compiler_params=pltpu.CompilerParams(
            dimension_semantics=("parallel",)
        ),
    )(x_t, w0t, w1t, w2t)

    # Back to the module's [N, D_out] layout (cheap XLA transpose of a thin slab).
    return out_t.T.astype(node_features.dtype)


def mlp_node_reference(node_features, w0, w1, w2):
    x = node_features.astype(jnp.float32)
    h = x @ w0 / math.sqrt(w0.shape[0])
    h = h * jax.nn.sigmoid(h)
    h = h @ w1 / math.sqrt(w1.shape[0])
    h = h * jax.nn.sigmoid(h)
    y = h @ w2 / math.sqrt(w2.shape[0])
    return y.astype(node_features.dtype)


if __name__ == "__main__":
    # Shapes consistent with MLPNode(__init__):
    #   input_irreps = "16x0e" -> D_in = 16
    #   num_layers = 2, hidden_dims = [32, 32], output_dim = 8
    #   2048 total graph nodes across the batch (padded to a tile multiple).
    N_NODES = 2048
    D_IN, H0, H1, D_OUT = 16, 32, 32, 8

    key = jax.random.PRNGKey(0)
    kx, k0, k1, k2 = jax.random.split(key, 4)

    node_features = jax.random.normal(kx, (N_NODES, D_IN), dtype=jnp.float32)
    # o3.Linear initializes weights ~ N(0, 1); normalization folded at runtime.
    w0 = jax.random.normal(k0, (D_IN, H0), dtype=jnp.float32)
    w1 = jax.random.normal(k1, (H0, H1), dtype=jnp.float32)
    w2 = jax.random.normal(k2, (H1, D_OUT), dtype=jnp.float32)

    ref = mlp_node_reference(node_features, w0, w1, w2)

    # f32-streamed path.
    out = mlp_node_forward(node_features, w0, w1, w2, tile_n=1024)
    out = jax.block_until_ready(out)
    assert out.shape == (N_NODES, D_OUT)
    assert jnp.allclose(out, ref, atol=1e-4, rtol=1e-4)

    # bf16-streamed path (f32 accumulation + f32 activations in-kernel).
    out_bf16 = mlp_node_forward(node_features, w0, w1, w2, tile_n=1024,
                                stream_bf16=True)
    out_bf16 = jax.block_until_ready(out_bf16)
    assert out_bf16.shape == (N_NODES, D_OUT)
    assert jnp.allclose(out_bf16, ref, atol=8e-2, rtol=8e-2)

    print("KERNEL_OK")
</pallas_src>

<mosaic_0001>
module attributes {stable_mosaic.version = 11 : i64} {
  func.func @mlp_node_kernel(%arg0: i32, %arg1: memref<16x1024xf32, #tpu.memory_space<vmem>>, %arg2: memref<32x16xf32, #tpu.memory_space<vmem>>, %arg3: memref<32x32xf32, #tpu.memory_space<vmem>>, %arg4: memref<8x32xf32, #tpu.memory_space<vmem>>, %arg5: memref<8x1024xf32, #tpu.memory_space<vmem>>) attributes {dimension_semantics = [#tpu.dimension_semantics<parallel>], iteration_bounds = array<i64: 2>, scalar_prefetch = 0 : i64, scratch_operands = 0 : i64, tpu.core_type = #tpu.core_type<tc>, window_params = [{transform_indices = @transform_0, window_bounds = array<i64: 16, 1024>}, {pipeline_mode = #tpu.pipeline_mode<synchronous>, transform_indices = @transform_1, window_bounds = array<i64: 32, 16>}, {pipeline_mode = #tpu.pipeline_mode<synchronous>, transform_indices = @transform_2, window_bounds = array<i64: 32, 32>}, {pipeline_mode = #tpu.pipeline_mode<synchronous>, transform_indices = @transform_3, window_bounds = array<i64: 8, 32>}, {transform_indices = @transform_4, window_bounds = array<i64: 8, 1024>}]} {
    %c0 = arith.constant 0 : index
    %c0_0 = arith.constant 0 : index
    %0 = vector.load %arg1[%c0, %c0_0] : memref<16x1024xf32, #tpu.memory_space<vmem>>, vector<16x1024xf32>
    %c0_1 = arith.constant 0 : index
    %c0_2 = arith.constant 0 : index
    %1 = vector.load %arg2[%c0_1, %c0_2] : memref<32x16xf32, #tpu.memory_space<vmem>>, vector<32x16xf32>
    %cst = arith.constant dense<0.000000e+00> : vector<32x1024xf32>
    %2 = tpu.matmul %1, %0, %cst {dimension_numbers = #tpu.dot_dimension_numbers<[1], [0], [0], [1], [0, 0, 1, 1], [], []>} : vector<32x16xf32>, vector<16x1024xf32>, vector<32x1024xf32> -> vector<32x1024xf32>
    %3 = arith.negf %2 : vector<32x1024xf32>
    %4 = math.exp %3 : vector<32x1024xf32>
    %cst_3 = arith.constant 1.000000e+00 : f32
    %5 = vector.broadcast %cst_3 : f32 to vector<32x1024xf32>
    %6 = arith.addf %5, %4 : vector<32x1024xf32>
    %7 = arith.divf %5, %6 : vector<32x1024xf32>
    %8 = arith.mulf %2, %7 : vector<32x1024xf32>
    %c0_4 = arith.constant 0 : index
    %c0_5 = arith.constant 0 : index
    %9 = vector.load %arg3[%c0_4, %c0_5] : memref<32x32xf32, #tpu.memory_space<vmem>>, vector<32x32xf32>
    %cst_6 = arith.constant dense<0.000000e+00> : vector<32x1024xf32>
    %10 = tpu.matmul %9, %8, %cst_6 {dimension_numbers = #tpu.dot_dimension_numbers<[1], [0], [0], [1], [0, 0, 1, 1], [], []>} : vector<32x32xf32>, vector<32x1024xf32>, vector<32x1024xf32> -> vector<32x1024xf32>
    %11 = arith.negf %10 : vector<32x1024xf32>
    %12 = math.exp %11 : vector<32x1024xf32>
    %cst_7 = arith.constant 1.000000e+00 : f32
    %13 = vector.broadcast %cst_7 : f32 to vector<32x1024xf32>
    %14 = arith.addf %13, %12 : vector<32x1024xf32>
    %15 = arith.divf %13, %14 : vector<32x1024xf32>
    %16 = arith.mulf %10, %15 : vector<32x1024xf32>
    %c0_8 = arith.constant 0 : index
    %c0_9 = arith.constant 0 : index
    %17 = vector.load %arg4[%c0_8, %c0_9] : memref<8x32xf32, #tpu.memory_space<vmem>>, vector<8x32xf32>
    %cst_10 = arith.constant dense<0.000000e+00> : vector<8x1024xf32>
    %18 = tpu.matmul %17, %16, %cst_10 {dimension_numbers = #tpu.dot_dimension_numbers<[1], [0], [0], [1], [0, 0, 1, 1], [], []>} : vector<8x32xf32>, vector<32x1024xf32>, vector<8x1024xf32> -> vector<8x1024xf32>
    %c0_11 = arith.constant 0 : index
    %c0_12 = arith.constant 0 : index
    %19 = vector.load %arg5[%c0_11, %c0_12] : memref<8x1024xf32, #tpu.memory_space<vmem>>, vector<8x1024xf32>
    tpu.vector_store %arg5[%c0_11, %c0_12], %18 {strides = array<i32>} : memref<8x1024xf32, #tpu.memory_space<vmem>>, vector<8x1024xf32>,
    return
  }
  func.func @transform_0(%arg0: i32) -> (i32, i32) {
    %c0_i32 = arith.constant 0 : i32
    %c0_i32_0 = arith.constant 0 : i32
    return %c0_i32, %arg0 : i32, i32
  }
  func.func @transform_1(%arg0: i32) -> (i32, i32) {
    %c0_i32 = arith.constant 0 : i32
    %c0_i32_0 = arith.constant 0 : i32
    %c0_i32_1 = arith.constant 0 : i32
    return %c0_i32, %c0_i32_0 : i32, i32
  }
  func.func @transform_2(%arg0: i32) -> (i32, i32) {
    %c0_i32 = arith.constant 0 : i32
    %c0_i32_0 = arith.constant 0 : i32
    %c0_i32_1 = arith.constant 0 : i32
    return %c0_i32, %c0_i32_0 : i32, i32
  }
  func.func @transform_3(%arg0: i32) -> (i32, i32) {
    %c0_i32 = arith.constant 0 : i32
    %c0_i32_0 = arith.constant 0 : i32
    %c0_i32_1 = arith.constant 0 : i32
    return %c0_i32, %c0_i32_0 : i32, i32
  }
  func.func @transform_4(%arg0: i32) -> (i32, i32) {
    %c0_i32 = arith.constant 0 : i32
    %c0_i32_0 = arith.constant 0 : i32
    return %c0_i32, %arg0 : i32, i32
  }
}

</mosaic_0001>

<bundles_post_ra>
// kernel: tpu_custom_call.1
= control target key start
LH: loop header
LB: loop body
LE: loop exit
PB: predicated region body
PF: predicated region fallthrough
CT: control target
= control target key end

     0   :  { %9 = vsyncpa [#allocation3], 0  ;;  %s3021_s0 = inlined_call_operand.hbm [shape: f32[16,2048], index: 0, kind: input, shape index: {}]   ;;  %s3022_s1 = inlined_call_operand.vmem [shape: f32[32,16], index: 1, kind: input, shape index: {}]   ;;  %s3023_s2 = inlined_call_operand.vmem [shape: f32[32,32], index: 2, kind: input, shape index: {}]   ;;  %s3024_s3 = inlined_call_operand.vmem [shape: f32[8,32], index: 3, kind: input, shape index: {}]   ;;  %s3025_s4 = inlined_call_operand.hbm [shape: f32[8,2048], index: 4, kind: output, shape index: {}]  }
   0x1   :  { %11 = vsyncpa [#allocation3 + $0x1], 0 }
   0x2   :  { %12 = vsyncpa [#allocation4], 0 }
   0x3   :  { %14 = vsyncpa [#allocation4 + $0x1], 0  ;;  %s2440_s15 = smov 0   ;;  %s2442_s16 = smov 0  }
   0x4   :  { %s2444_s17 = smov 0   ;;  %s2446_s18 = smov 0  }
   0x5 LB: > { %s2461_s19 = sadd.s32 4294967295, %s2407_s18   ;;  %s1809_s20 = sadd.s32 4294967294, %s2407_s18   ;;  %s2407_s18 = sphi %s2446_s18, %s3039_s18   ;;  %s2403_s17 = sphi %s2444_s17, %s3038_s17   ;;  %s2399_s16 = sphi %s2442_s16, %s3037_s16   ;;  %s2395_s15 = sphi %s2440_s15, %s3036_s15  }
   0x6   : > { %s2465_s21 = sadd.s32 1, %s2407_s18   ;;  %s27_s22 = sadd.s32 1, %s2403_s17 }
   0x7   : > { %s24_s23 = ssub.s32 %s2407_s18, %s2465_s21  ;;  %p34_p0 = scmp.ne.s32.totalorder %s2403_s17, %s2399_s16 }
   0x8   : > { %p25_p1 = scmp.eq.s32.totalorder %s24_s23, 0  ;;  %p35_p2 = scmp.eq.s32.totalorder %s2407_s18, 0 }
   0x9   : > { %p40_p3 = scmp.ne.s32.totalorder %s2399_s16, %s2395_s15  ;;  %p41_p4 = scmp.eq.s32.totalorder %s2461_s19, 0 }
   0xa   : > { %s2477_s24 = scalar_select %p25_p1, %s2403_s17, %s27_s22  }
   0xb   : > { %p2479_p5 = por %p35_p2, %p34_p0  ;;  %p2483_p6 = por %p41_p4, %p40_p3 }
   0xc   : > { %p127_p7 = scmp.eq.s32.totalorder %s2461_s19, 1  ;;  %p133_p8 = scmp.eq.s32.totalorder %s1809_s20, 1 }
   0xd   : > { %p2017_p10 = scmp.lt.s32.totalorder %s2407_s18, 2  ;;  %s162_s29 = sand.u32 1, %s2403_s17  }
   0xe   : > { %p2490_p11 = por %p127_p7, %p34_p0  ;;  %p2494_p12 = por %p133_p8, %p40_p3 }
   0xf   : > { %s1923_s30 = sshll.u32 %s2407_s18, 10  ;;  %s1812_s5 = sshll.u32 %s162_s29, 7 }
  0x10   : > { %s3029_s27 = scalar_select %p2490_p11, 1, 0 }
  0x11   : > { %s3030_s28 = scalar_select %p2494_p12, 1, 0 }
  0x12   : > { %s2503_s8 = scalar_lea.hbm %s3021_s0, %s1923_s30  ;;  %s166_s9 = scalar_lea.vmem [#allocation2], %s1812_s5 }
  0x13   : > { %s173_s10 = sshll.u32 %s166_s9, 4  ;;  %p2507_p13 = pnand %p2017_p10, %p2479_p5  ;;  %s2511_s10 = int_to_ptr.vmem [resolvable:$true] %s173_s10 }
  0x14   : > { %s2514_s12 = scalar_lea.sflag [#allocation3], %s162_s29  ;;  %s2311_s13 = scalar_lea.hbm %s2503_s8, 2048 }
  0x15   : > { %p2312_p1 = scmp.ne.s32.totalorder %s2503_s8, %s2311_s13  ;;  %p2313_p2 = pneg %p2507_p13 }
  0x16   : > { %s2316_s22 = scalar_lea.hbm %s3021_s0, 4096  ;;  %p2317_p5 = scmp.lt.u32.totalorder %s2503_s8, %s3021_s0 }
  0x17   : > { %p2314_p3 = pnand %p2313_p2, %p2312_p1  ;;  %p2318_p7 = scmp.lt.u32.totalorder %s2316_s22, %s2311_s13 }
  0x18   : > { %p2320_p10 = scmp.lt.u32.totalorder %s2311_s13, %s2503_s8 }
  0x19   : > { %p2315_p4 = pneg %p2314_p3  ;;  %p2319_p8 = por %p2318_p7, %p2317_p5 }
  0x1b   : > { %p2321_p9 = por %p2320_p10, %p2319_p8 }
  0x1d   : > { %p2322_p0 = pnand %p2321_p9, %p2315_p4 }
  0x1f   : > { %2325 = shalt.err (!%p2322_p0)
}
  0x20   : > { %s2326_s29 = scalar_lea.vmem %s2511_s10, 2048  ;;  %s2409_s30 = smov [#allocation2]  }
  0x21   : > { %p2327_p1 = scmp.ne.s32.totalorder %s2511_s10, %s2326_s29  ;;  %s2331_s5 = sshll.u32 %s2409_s30, 4  ;;  %s2332_s5 = int_to_ptr.vmem [resolvable:$false] %s2331_s5 }
  0x22   : > { %s2333_s6 = scalar_lea.vmem %s2332_s5, 4096  ;;  %p2334_p11 = scmp.lt.s32.totalorder %s2511_s10, %s2332_s5 }
  0x23   : > { %p2329_p3 = pnand %p2327_p1, %p2313_p2  ;;  %p2335_p5 = scmp.lt.s32.totalorder %s2333_s6, %s2326_s29 }
  0x25   : > { %p2330_p12 = pneg %p2329_p3  ;;  %p2336_p7 = por %p2335_p5, %p2334_p11 }
  0x27   : > { %p2337_p8 = pnand %p2336_p7, %p2330_p12 }
  0x29   : > { %2340 = shalt.err (!%p2337_p8)
}
  0x2a   : > { %s2410_s7 = smov 2048   ;;  %s2411_s9 = smov 1024  }
  0x2b   : > { %s2412_s13 = smov 64   ;;  %p181_p9 = scmp.lt.s32.totalorder %s2407_s18, 3 }
  0x2c   : > { %2012 = dma.hbm_to_vmem [thread:$0]  (!%p2507_p13), %s2503_s8, 2048, %s2511_s10, %s2514_s12, %s2410_s7, %s2411_s9, %s2412_s13  }
  0x2d   : > { %p3032_p0 = scmp.ge.s32.totalorder %s2407_s18, 1 }
  0x2f   : > { %p182_p2 = pnand %p3032_p0, %p181_p9 }
  0x30   : > { %s2546_s14 = sand.u32 (!%p182_p2), 1, %s2399_s16  }
  0x31   : > { %185 = sbr.rel (%p182_p2) target bundleno = 866 (0x362), region = 36  ;;  %s1816_s20 = sshll.u32 (!%p182_p2), %s2546_s14, 7 }
  0x32   : > { %s188_s22 = scalar_lea.sflag (!%p182_p2), [#allocation3], %s2546_s14  ;;  %s2550_s23 = scalar_lea.vmem (!%p182_p2), [#allocation2], %s1816_s20 }
  0x38   : > { %2386 = dma.done.wait (%p2483_p6), %s188_s22, 2048  }
  0x39   : > { %2388 = vsyncadd (%p2483_p6), %s188_s22, 4294965248  ;;  %v2413_v0 = vmov 0.0   ;;  %v219_v1 = vld [vmem:[%s2550_s23 + $0x8] sm:$0xff]  ;;  %v221_v3 = vld [vmem:[%s2550_s23 + $0x18] sm:$0xff]  ;;  %vm238_vm0 = vcmask 130048   ;;  %vm835_vm1 = vcmask 261120  }
  0x3a   : > { %315 = vmatprep.mubr.f32.mxu0 %v2413_v0  ;;  %404 = vmatprep.mubr.f32.mxu1 %v2413_v0  ;;  %v227_v2 = vld [vmem:[%s2550_s23 + $0x48] sm:$0xff]  ;;  %v229_v5 = vld [vmem:[%s2550_s23 + $0x58] sm:$0xff]  ;;  %v218_v6 = vld [vmem:[%s2550_s23] sm:$0xff]  ;;  %s1817_s10 = sshll.u32 %s2546_s14, 6  ;;  %s1924_s12 = sshll.u32 %s2461_s19, 10 }
  0x3b   : > { %v1925_v4 = vpack.c.bf16 %v227_v2, %v219_v1  ;;  %v226_v7 = vld [vmem:[%s2550_s23 + $0x40] sm:$0xff]  ;;  %v1929_v8 = vpack.c.bf16 %v229_v5, %v221_v3  ;;  %v220_v10 = vld [vmem:[%s2550_s23 + $0x10] sm:$0xff]  ;;  %v223_v14 = vld [vmem:[%s2550_s23 + $0x28] sm:$0xff]  ;;  %s215_s11 = scalar_lea.vmem [#allocation5], %s1817_s10  ;;  %s2977_s5 = scalar_lea.hbm %s3025_s4, %s1924_s12 }
  0x3c   : > { %v1927_v9 = vpack.c.bf16 %v226_v7, %v218_v6  ;;  %v228_v11 = vld [vmem:[%s2550_s23 + $0x50] sm:$0xff]  ;;  %v234_v13 = vld [vmem:[%s3022_s1] sm:$0xff]  ;;  %v231_v15 = vld [vmem:[%s2550_s23 + $0x68] sm:$0xff]  ;;  %s1739_s25 = sshll.u32 %s215_s11, 4  ;;  %s1725_s19 = scalar_lea.sflag [#allocation4], %s2546_s14  ;;  %s2979_s25 = int_to_ptr.vmem [resolvable:$true] %s1739_s25 }
  0x3d   : > { %1926 = vmatprep.subr.bf16.mxu0 %v1925_v4  ;;  %v1931_v12 = vpack.c.bf16 %v228_v11, %v220_v10  ;;  %1930 = vmatprep.subr.bf16.mxu1 %v1929_v8  ;;  %v1933_v16 = vpack.c.bf16 %v231_v15, %v223_v14  ;;  %v225_v17 = vld [vmem:[%s2550_s23 + $0x38] sm:$0xff]  ;;  %v222_v19 = vld [vmem:[%s2550_s23 + $0x20] sm:$0xff]  ;;  %v224_v22 = vld [vmem:[%s2550_s23 + $0x30] sm:$0xff]  ;;  %s2341_s6 = scalar_lea.vmem %s2979_s25, 1024  ;;  %p3033_p11 = scmp.ne.s32.totalorder %s3029_s27, 0 }
  0x3e   : > { %1928 = vmatpush1.bf16.msra.mxu0 %v1927_v9  ;;  %v233_v18 = vld [vmem:[%s2550_s23 + $0x78] sm:$0xff]  ;;  %v230_v21 = vld [vmem:[%s2550_s23 + $0x60] sm:$0xff]  ;;  %v232_v23 = vld [vmem:[%s2550_s23 + $0x70] sm:$0xff]  ;;  %p2342_p6 = scmp.ne.s32.totalorder %s2979_s25, %s2341_s6  ;;  %s2414_s7 = smov [#allocation5]  }
  0x3f   : > { %1932 = vmatpush1.bf16.msra.mxu1 %v1931_v12  ;;  %v1937_v20 = vpack.c.bf16 %v233_v18, %v225_v17  ;;  %1934 = vmatprep.subr.bf16.mxu0 %v1933_v16  ;;  %v1935_v24 = vpack.c.bf16 %v230_v21, %v222_v19  ;;  %v1939_v25 = vpack.c.bf16 %v232_v23, %v224_v22  ;;  %v235_v26 = vld [vmem:[%s3022_s1 + $0x8] sm:$0xff]  ;;  %v236_v27 = vld [vmem:[%s3022_s1 + $0x10] sm:$0xff]  ;;  %v237_v28 = vld [vmem:[%s3022_s1 + $0x18] sm:$0xff]  ;;  %s2345_s9 = sshll.u32 %s2414_s7, 4  ;;  %s2346_s9 = int_to_ptr.vmem [resolvable:$false] %s2345_s9 }
  0x40   : > { %p2343_p12 = pnand %p2342_p6, %p3033_p11  ;;  %s2347_s13 = scalar_lea.vmem %s2346_s9, 2048 }
  0x41   : > { %1818 = vmatmul.mubr.msk.f32.vlgmr.msra.gmra.mrb[0].mxu0 %vm238_vm0, %v234_v13  ;;  %1938 = vmatprep.subr.bf16.mxu1 %v1937_v20  ;;  %p2348_p4 = scmp.lt.s32.totalorder %s2979_s25, %s2346_s9  ;;  %p2349_p10 = scmp.lt.s32.totalorder %s2347_s13, %s2341_s6 }
  0x42   : > { %1822 = vmatmul.mubr.msk.f32.vlgmr.msra.gmra.mrb[0].mxu1 %vm238_vm0, %v234_v13  ;;  %321 = vmatprep.mubr.f32.mxu0 %v2413_v0  ;;  %p2344_p13 = pneg %p2343_p12 }
  0x43   : > { %410 = vmatprep.mubr.f32.mxu1 %v2413_v0  ;;  %1936 = vmatpush1.bf16.msra.mxu0 %v1935_v24  ;;  %p2350_p1 = por %p2349_p10, %p2348_p4 }
  0x44   : > { %1940 = vmatpush1.bf16.msra.mxu1 %v1939_v25 }
  0x45   : > { %1819 = vmatmul.mubr.msk.f32.gmra.mrb[2].mxu0 %vm238_vm0, %v235_v26  ;;  %p2351_p3 = pnand %p2350_p1, %p2344_p13 }
  0x46   : > { %1823 = vmatmul.mubr.msk.f32.gmra.mrb[2].mxu1 %vm238_vm0, %v235_v26  ;;  %327 = vmatprep.mubr.f32.mxu0 %v2413_v0 }
  0x47   : > { %416 = vmatprep.mubr.f32.mxu1 %v2413_v0 }
  0x49   : > { %1820 = vmatmul.mubr.msk.f32.gmra.mrb[4].mxu0 %vm238_vm0, %v236_v27 }
  0x4a   : > { %1824 = vmatmul.mubr.msk.f32.gmra.mrb[4].mxu1 %vm238_vm0, %v236_v27  ;;  %333 = vmatprep.mubr.f32.mxu0 %v2413_v0 }
  0x4b   : > { %422 = vmatprep.mubr.f32.mxu1 %v2413_v0 }
  0x4d   : > { %1821 = vmatmul.mubr.msk.f32.gmra.mrb[6].mxu0 %vm238_vm0, %v237_v28 }
  0x4e   : > { %1825 = vmatmul.mubr.msk.f32.gmra.mrb[6].mxu1 %vm238_vm0, %v237_v28  ;;  %493 = vmatprep.mubr.f32.mxu0 %v2413_v0 }
  0x4f   : > { %582 = vmatprep.mubr.f32.mxu1 %v2413_v0 }
  0x51   : > { %1826 = vmatmul.mubr.msk.f32.vlgmr.msra.gmra.mrb[8].mxu0 %vm238_vm0, %v234_v13 }
  0x52   : > { %1830 = vmatmul.mubr.msk.f32.vlgmr.msra.gmra.mrb[8].mxu1 %vm238_vm0, %v234_v13  ;;  %499 = vmatprep.mubr.f32.mxu0 %v2413_v0 }
  0x53   : > { %588 = vmatprep.mubr.f32.mxu1 %v2413_v0 }
  0x55   : > { %1827 = vmatmul.mubr.msk.f32.gmra.mrb[10].mxu0 %vm238_vm0, %v235_v26 }
  0x56   : > { %1831 = vmatmul.mubr.msk.f32.gmra.mrb[10].mxu1 %vm238_vm0, %v235_v26  ;;  %505 = vmatprep.mubr.f32.mxu0 %v2413_v0 }
  0x57   : > { %594 = vmatprep.mubr.f32.mxu1 %v2413_v0 }
  0x59   : > { %1828 = vmatmul.mubr.msk.f32.gmra.mrb[12].mxu0 %vm238_vm0, %v236_v27 }
  0x5a   : > { %1832 = vmatmul.mubr.msk.f32.gmra.mrb[12].mxu1 %vm238_vm0, %v236_v27  ;;  %511 = vmatprep.mubr.f32.mxu0 %v2413_v0 }
  0x5b   : > { %600 = vmatprep.mubr.f32.mxu1 %v2413_v0 }
  0x5d   : > { %1829 = vmatmul.mubr.msk.f32.gmra.mrb[14].mxu0 %vm238_vm0, %v237_v28 }
  0x5e   : > { %1833 = vmatmul.mubr.msk.f32.gmra.mrb[14].mxu1 %vm238_vm0, %v237_v28  ;;  %912 = vmatprep.mubr.f32.mxu0 %v2413_v0 }
  0x5f   : > { %1001 = vmatprep.mubr.f32.mxu1 %v2413_v0 }
 0x114   : > { %v2618_v29 = vpop.f32.mrb[0].mxu0 }
 0x115   : > { %v1834_v30 = vmul.f32 -1.442695, %v2618_v29  ;;  %v2621_v31 = vpop.f32.mrb[0].mxu1  ;;  %v2623_v32 = vpop.f32.mrb[1].mxu0 }
 0x116   : > { %v1836_v33 = vmul.f32 -1.442695, %v2621_v31  ;;  %v1835_v34 = vmul.f32 -1.442695, %v2623_v32  ;;  %v2627_v35 = vpop.f32.mrb[1].mxu1 }
 0x117   : > { %2055 = vpow2.f32 %v1834_v30  ;;  %v1837_v36 = vmul.f32 -1.442695, %v2627_v35 }
 0x118   : > { %2057 = vpow2.f32 %v1836_v33  ;;  %v2630_v37 = vpop.f32.mrb[2].mxu0 }
 0x119   : > { %2059 = vpow2.f32 %v1835_v34  ;;  %v1842_v38 = vmul.f32 -1.442695, %v2630_v37  ;;  %v2633_v39 = vpop.f32.mrb[2].mxu1  ;;  %v2635_v40 = vpop.f32.mrb[3].mxu0 }
 0x11a   : > { %2061 = vpow2.f32 %v1837_v36  ;;  %v1844_v41 = vmul.f32 -1.442695, %v2633_v39  ;;  %v1843_v42 = vmul.f32 -1.442695, %v2635_v40  ;;  %v2639_v43 = vpop.f32.mrb[3].mxu1 }
 0x11b   : > { %2063 = vpow2.f32 %v1842_v38  ;;  %v1845_v44 = vmul.f32 -1.442695, %v2639_v43 }
 0x11c   : > { %2065 = vpow2.f32 %v1844_v41  ;;  %v2642_v45 = vpop.f32.mrb[4].mxu0 }
 0x11d   : > { %2067 = vpow2.f32 %v1843_v42  ;;  %v1850_v46 = vmul.f32 -1.442695, %v2642_v45  ;;  %v2645_v47 = vpop.f32.mrb[4].mxu1  ;;  %v2647_v48 = vpop.f32.mrb[5].mxu0 }
 0x11e   : > { %2069 = vpow2.f32 %v1845_v44  ;;  %v1852_v49 = vmul.f32 -1.442695, %v2645_v47  ;;  %v1851_v50 = vmul.f32 -1.442695, %v2647_v48  ;;  %v2651_v51 = vpop.f32.mrb[5].mxu1 }
 0x11f   : > { %2071 = vpow2.f32 %v1850_v46  ;;  %v1853_v52 = vmul.f32 -1.442695, %v2651_v51 }
 0x120   : > { %2073 = vpow2.f32 %v1852_v49  ;;  %v2654_v53 = vpop.f32.mrb[6].mxu0 }
 0x121   : > { %v2056_v54 = vpop.eup %2055  ;;  %2075 = vpow2.f32 %v1851_v50  ;;  %v1858_v55 = vmul.f32 -1.442695, %v2654_v53  ;;  %v2657_v56 = vpop.f32.mrb[6].mxu1 }
 0x122   : > { %v2659_v57 = vpop.f32.mrb[7].mxu0  ;;  %v2058_v58 = vpop.eup %2057  ;;  %v703_v59 = vadd.f32 1.0, %v2056_v54  ;;  %2077 = vpow2.f32 %v1853_v52  ;;  %v1860_v30 = vmul.f32 -1.442695, %v2657_v56 }
 0x123   : > { %v2661_v60 = vpop.f32.mrb[7].mxu1  ;;  %v2060_v61 = vpop.eup %2059  ;;  %v705_v62 = vadd.f32 1.0, %v2058_v58  ;;  %2079 = vpow2.f32 %v1858_v55  ;;  %v1859_v41 = vmul.f32 -1.442695, %v2659_v57 }
 0x124   : > { %v2062_v63 = vpop.eup %2061  ;;  %2081 = vrcp.f32 %v703_v59  ;;  %v704_v1 = vadd.f32 1.0, %v2060_v61  ;;  %v2663_v2 = vpop.f32.mrb[8].mxu0  ;;  %v1861_v46 = vmul.f32 -1.442695, %v2661_v60 }
 0x125   : > { %v2064_v3 = vpop.eup %2063  ;;  %2083 = vrcp.f32 %v705_v62  ;;  %v706_v4 = vadd.f32 1.0, %v2062_v63  ;;  %v2665_v5 = vpop.f32.mrb[8].mxu1  ;;  %v1838_v50 = vmul.f32 -1.442695, %v2663_v2 }
 0x126   : > { %v2667_v6 = vpop.f32.mrb[9].mxu0  ;;  %v2066_v7 = vpop.eup %2065  ;;  %2085 = vrcp.f32 %v704_v1  ;;  %v711_v8 = vadd.f32 1.0, %v2064_v3  ;;  %v1840_v55 = vmul.f32 -1.442695, %v2665_v5 }
 0x127   : > { %v2669_v9 = vpop.f32.mrb[9].mxu1  ;;  %v2068_v10 = vpop.eup %2067  ;;  %2087 = vrcp.f32 %v706_v4  ;;  %v713_v11 = vadd.f32 1.0, %v2066_v7  ;;  %v1839_v58 = vmul.f32 -1.442695, %v2667_v6 }
 0x128   : > { %v2070_v12 = vpop.eup %2069  ;;  %2089 = vrcp.f32 %v711_v8  ;;  %v712_v13 = vadd.f32 1.0, %v2068_v10  ;;  %v2671_v14 = vpop.f32.mrb[10].mxu0  ;;  %v1841_v63 = vmul.f32 -1.442695, %v2669_v9 }
 0x129   : > { %v2072_v15 = vpop.eup %2071  ;;  %2091 = vrcp.f32 %v713_v11  ;;  %v714_v16 = vadd.f32 1.0, %v2070_v12  ;;  %v2673_v17 = vpop.f32.mrb[10].mxu1  ;;  %v1846_v1 = vmul.f32 -1.442695, %v2671_v14 }
 0x12a   : > { %v2675_v18 = vpop.f32.mrb[11].mxu0  ;;  %v2074_v19 = vpop.eup %2073  ;;  %2093 = vrcp.f32 %v712_v13  ;;  %v719_v20 = vadd.f32 1.0, %v2072_v15  ;;  %v1848_v10 = vmul.f32 -1.442695, %v2673_v17 }
 0x12b   : > { %v2677_v21 = vpop.f32.mrb[11].mxu1  ;;  %v2076_v22 = vpop.eup %2075  ;;  %2095 = vrcp.f32 %v714_v16  ;;  %v721_v23 = vadd.f32 1.0, %v2074_v19  ;;  %v1847_v15 = vmul.f32 -1.442695, %v2675_v18 }
 0x12c   : > { %v2078_v24 = vpop.eup %2077  ;;  %2097 = vrcp.f32 %v719_v20  ;;  %v720_v25 = vadd.f32 1.0, %v2076_v22  ;;  %v2679_v26 = vpop.f32.mrb[12].mxu0 }
 0x12d   : > { %v2080_v27 = vpop.eup %2079  ;;  %2099 = vrcp.f32 %v721_v23  ;;  %v722_v28 = vadd.f32 1.0, %v2078_v24  ;;  %v2682_v33 = vpop.f32.mrb[12].mxu1 }
 0x12e   : > { %v2684_v34 = vpop.f32.mrb[13].mxu0  ;;  %v2082_v36 = vpop.eup %2081  ;;  %2101 = vrcp.f32 %v720_v25  ;;  %v727_v38 = vadd.f32 1.0, %v2080_v27 }
 0x12f   : > { %v2687_v42 = vpop.f32.mrb[13].mxu1  ;;  %v2084_v44 = vpop.eup %2083  ;;  %2103 = vrcp.f32 %v722_v28  ;;  %v799_v7 = vmul.f32 %v2082_v36, %v2618_v29 }
 0x130   : > { %v2086_v49 = vpop.eup %2085  ;;  %2105 = vrcp.f32 %v727_v38  ;;  %v2691_v52 = vpop.f32.mrb[14].mxu0  ;;  %v801_v12 = vmul.f32 %v2084_v44, %v2621_v31 }
 0x131   : > { %v2088_v54 = vpop.eup %2087  ;;  %2107 = vpow2.f32 %v1860_v30  ;;  %v2695_v59 = vpop.f32.mrb[14].mxu1  ;;  %v800_v19 = vmul.f32 %v2086_v49, %v2623_v32  ;;  %v1854_v32 = vmul.f32 -1.442695, %v2679_v26 }
 0x132   : > { %v2697_v61 = vpop.f32.mrb[15].mxu0  ;;  %v2090_v62 = vpop.eup %2089  ;;  %2109 = vpow2.f32 %v1859_v41 }
 0x133   : > { %v2701_v3 = vpop.f32.mrb[15].mxu1  ;;  %v2092_v4 = vpop.eup %2091  ;;  %v807_v8 = vmul.f32 %v2090_v62, %v2630_v37  ;;  %2111 = vpow2.f32 %v1861_v46  ;;  %v802_v37 = vmul.f32 %v2088_v54, %v2627_v35 }
 0x134   : > { %v2094_v11 = vpop.eup %2093  ;;  %v809_v13 = vmul.f32 %v2092_v4, %v2633_v39  ;;  %2113 = vpow2.f32 %v1838_v50  ;;  %v1849_v39 = vmul.f32 -1.442695, %v2677_v21 }
 0x135   : > { %v2096_v16 = vpop.eup %2095  ;;  %v1943_v20 = vpack.c.bf16 %v807_v8, %v799_v7  ;;  %v808_v22 = vmul.f32 %v2094_v11, %v2635_v40  ;;  %2115 = vpow2.f32 %v1840_v55  ;;  %v1856_v40 = vmul.f32 -1.442695, %v2682_v33 }
 0x136   : > { %v2098_v29 = vpop.eup %2097  ;;  %v1951_v23 = vpack.c.bf16 %v809_v13, %v801_v12  ;;  %v810_v24 = vmul.f32 %v2096_v16, %v2639_v43  ;;  %2117 = vpow2.f32 %v1839_v58 }
 0x137   : > { %v2100_v31 = vpop.eup %2099  ;;  %v1941_v25 = vpack.c.bf16 %v808_v22, %v800_v19  ;;  %2119 = vpow2.f32 %v1841_v63  ;;  %v2719_v36 = vmul.f32 %v2098_v29, %v2642_v45  ;;  %v1855_v22 = vmul.f32 -1.442695, %v2684_v34 }
 0x138   : > { %v2102_v27 = vpop.eup %2101  ;;  %v1949_v28 = vpack.c.bf16 %v810_v24, %v802_v37  ;;  %2121 = vpow2.f32 %v1846_v1  ;;  %v1857_v37 = vmul.f32 -1.442695, %v2687_v42  ;;  %v817_v24 = vmul.f32 %v2100_v31, %v2645_v47 }
 0x139   : > { %v2715_v30 = vpop.eup %2103  ;;  %2123 = vpow2.f32 %v1848_v10  ;;  %1942 = vmatprep.subr.bf16.mxu0 %v1941_v25 }
 0x13a   : > { %v2106_v35 = vpop.eup %2105  ;;  %2125 = vpow2.f32 %v1847_v15  ;;  %1950 = vmatprep.subr.bf16.mxu1 %v1949_v28  ;;  %1944 = vmatpush1.bf16.msra.mxu0 %v1943_v20 }
 0x13b   : > { %v2108_v43 = vpop.eup %2107  ;;  %v2722_v38 = vmul.f32 %v2106_v35, %v2654_v53  ;;  %2127 = vpow2.f32 %v1849_v39  ;;  %1952 = vmatpush1.bf16.msra.mxu1 %v1951_v23  ;;  %v1862_v39 = vmul.f32 -1.442695, %v2691_v52  ;;  %v1864_v35 = vmul.f32 -1.442695, %v2695_v59 }
 0x13c   : > { %v2110_v41 = vpop.eup %2109  ;;  %v729_v44 = vadd.f32 1.0, %v2108_v43  ;;  %2129 = vpow2.f32 %v1854_v32  ;;  %v816_v32 = vmul.f32 %v2102_v27, %v2647_v48  ;;  %v1863_v43 = vmul.f32 -1.442695, %v2697_v61 }
 0x13d   : > { %v2112_v46 = vpop.eup %2111  ;;  %v1947_v49 = vpack.c.bf16 %v2722_v38, %v2719_v36  ;;  %v728_v50 = vadd.f32 1.0, %v2110_v41  ;;  %2131 = vpow2.f32 %v1856_v40  ;;  %v818_v38 = vmul.f32 %v2715_v30, %v2651_v51  ;;  %v2742_v51 = vld [vmem:[%s3023_s2] sm:$0xff] }
 0x13e   : > { %v2114_v54 = vpop.eup %2113  ;;  %2133 = vrcp.f32 %v729_v44  ;;  %v730_v55 = vadd.f32 1.0, %v2112_v46  ;;  %v1865_v44 = vmul.f32 -1.442695, %v2701_v3 }
 0x13f   : > { %v2116_v58 = vpop.eup %2115  ;;  %2135 = vrcp.f32 %v728_v50  ;;  %v707_v45 = vadd.f32 1.0, %v2114_v54 }
 0x140   : > { %v2118_v62 = vpop.eup %2117  ;;  %2137 = vrcp.f32 %v730_v55  ;;  %v709_v53 = vadd.f32 1.0, %v2116_v58 }
 0x141   : > { %v2120_v63 = vpop.eup %2119  ;;  %2139 = vrcp.f32 %v707_v45  ;;  %v708_v1 = vadd.f32 1.0, %v2118_v62 }
 0x142   : > { %v2122_v4 = vpop.eup %2121  ;;  %2141 = vrcp.f32 %v709_v53  ;;  %v710_v7 = vadd.f32 1.0, %v2120_v63 }
 0x143   : > { %v2124_v8 = vpop.eup %2123  ;;  %2143 = vrcp.f32 %v708_v1  ;;  %v715_v10 = vadd.f32 1.0, %v2122_v4 }
 0x144   : > { %v2126_v11 = vpop.eup %2125  ;;  %2145 = vrcp.f32 %v710_v7  ;;  %v717_v12 = vadd.f32 1.0, %v2124_v8 }
 0x145   : > { %v2128_v13 = vpop.eup %2127  ;;  %2147 = vrcp.f32 %v715_v10  ;;  %v716_v15 = vadd.f32 1.0, %v2126_v11  ;;  %v833_v10 = vld [vmem:[%s3023_s2 + $0x10] sm:$0xff] }
 0x146   : > { %v2130_v16 = vpop.eup %2129  ;;  %2149 = vrcp.f32 %v717_v12  ;;  %v718_v19 = vadd.f32 1.0, %v2128_v13 }
 0x147   : > { %v2132_v20 = vpop.eup %2131  ;;  %2151 = vrcp.f32 %v716_v15  ;;  %v723_v63 = vadd.f32 1.0, %v2130_v16 }
 0x148   : > { %v2134_v29 = vpop.eup %2133  ;;  %2153 = vrcp.f32 %v718_v19  ;;  %v725_v4 = vadd.f32 1.0, %v2132_v20 }
 0x149   : > { %v2136_v23 = vpop.eup %2135  ;;  %v825_v25 = vmul.f32 %v2134_v29, %v2657_v56  ;;  %2155 = vpow2.f32 %v1855_v22  ;;  %v834_v22 = vld [vmem:[%s3023_s2 + $0x18] sm:$0xff] }
 0x14a   : > { %v2138_v28 = vpop.eup %2137  ;;  %v824_v40 = vmul.f32 %v2136_v23, %v2659_v57  ;;  %2157 = vpow2.f32 %v1857_v37 }
 0x14b   : > { %v2140_v36 = vpop.eup %2139  ;;  %v1955_v41 = vpack.c.bf16 %v825_v25, %v817_v24  ;;  %v826_v47 = vmul.f32 %v2138_v28, %v2661_v60  ;;  %2159 = vpow2.f32 %v1862_v39 }
 0x14c   : > { %v2142_v56 = vpop.eup %2141  ;;  %v1945_v31 = vpack.c.bf16 %v824_v40, %v816_v32  ;;  %2161 = vpow2.f32 %v1864_v35  ;;  %v803_v30 = vmul.f32 %v2140_v36, %v2663_v2 }
 0x14d   : > { %v2144_v48 = vpop.eup %2143  ;;  %v1953_v27 = vpack.c.bf16 %v826_v47, %v818_v38  ;;  %2163 = vpow2.f32 %v1863_v43  ;;  %v805_v55 = vmul.f32 %v2142_v56, %v2665_v5  ;;  %v2760_v5 = vld [vmem:[%s3023_s2 + $0x8] sm:$0xff] }
 0x14e   : > { %v2146_v57 = vpop.eup %2145  ;;  %1946 = vmatprep.subr.bf16.mxu0 %v1945_v31  ;;  %2165 = vpow2.f32 %v1865_v44 }
 0x14f   : > { %v2148_v46 = vpop.eup %2147  ;;  %1954 = vmatprep.subr.bf16.mxu1 %v1953_v27  ;;  %1948 = vmatpush1.bf16.msra.mxu0 %v1947_v49  ;;  %v804_v49 = vmul.f32 %v2144_v48, %v2667_v6  ;;  %v806_v2 = vmul.f32 %v2146_v57, %v2669_v9  ;;  %2167 = vrcp.f32 %v723_v63 }
 0x150   : > { %v2150_v60 = vpop.eup %2149  ;;  %v811_v50 = vmul.f32 %v2148_v46, %v2671_v14  ;;  %1956 = vmatpush1.bf16.msra.mxu1 %v1955_v41  ;;  %2169 = vrcp.f32 %v725_v4 }
 0x151   : > { %v2152_v54 = vpop.eup %2151  ;;  %v813_v58 = vmul.f32 %v2150_v60, %v2673_v17 }
 0x152   : > { %v2154_v45 = vpop.eup %2153  ;;  %v1959_v62 = vpack.c.bf16 %v811_v50, %v803_v30  ;;  %v812_v53 = vmul.f32 %v2152_v54, %v2675_v18  ;;  %1866 = vmatmul.mubr.msk.f32.vlgmr.msra.gmra.mrb[16].mxu0 %vm835_vm1, %v2742_v51 }
 0x153   : > { %v1967_v14 = vpack.c.bf16 %v813_v58, %v805_v55  ;;  %v814_v1 = vmul.f32 %v2154_v45, %v2677_v21  ;;  %1870 = vmatmul.mubr.msk.f32.vlgmr.msra.gmra.mrb[16].mxu1 %vm835_vm1, %v2742_v51  ;;  %918 = vmatprep.mubr.f32.mxu0 %v2413_v0  ;;  %v2156_v17 = vpop.eup %2155 }
 0x154   : > { %v1957_v6 = vpack.c.bf16 %v812_v53, %v804_v49  ;;  %1007 = vmatprep.mubr.f32.mxu1 %v2413_v0  ;;  %v2158_v9 = vpop.eup %2157  ;;  %v724_v7 = vadd.f32 1.0, %v2156_v17 }
 0x155   : > { %v1965_v18 = vpack.c.bf16 %v814_v1, %v806_v2  ;;  %v2160_v21 = vpop.eup %2159  ;;  %v726_v8 = vadd.f32 1.0, %v2158_v9 }
 0x156   : > { %1867 = vmatmul.mubr.msk.f32.gmra.mrb[18].mxu0 %vm835_vm1, %v2760_v5  ;;  %1958 = vmatprep.subr.bf16.mxu0 %v1957_v6  ;;  %v2162_v11 = vpop.eup %2161  ;;  %2171 = vrcp.f32 %v724_v7  ;;  %v731_v12 = vadd.f32 1.0, %v2160_v21 }
 0x157   : > { %1871 = vmatmul.mubr.msk.f32.gmra.mrb[18].mxu1 %vm835_vm1, %v2760_v5  ;;  %1966 = vmatprep.subr.bf16.mxu1 %v1965_v18  ;;  %v2164_v13 = vpop.eup %2163  ;;  %2173 = vrcp.f32 %v726_v8  ;;  %v733_v15 = vadd.f32 1.0, %v2162_v11 }
 0x158   : > { %1960 = vmatpush1.bf16.msra.mxu0 %v1959_v62  ;;  %1968 = vmatpush1.bf16.msra.mxu1 %v1967_v14  ;;  %v2166_v16 = vpop.eup %2165  ;;  %2175 = vrcp.f32 %v731_v12  ;;  %v732_v19 = vadd.f32 1.0, %v2164_v13 }
 0x159   : > { %924 = vmatprep.mubr.f32.mxu0 %v2413_v0  ;;  %1013 = vmatprep.mubr.f32.mxu1 %v2413_v0  ;;  %2177 = vrcp.f32 %v733_v15  ;;  %v734_v20 = vadd.f32 1.0, %v2166_v16  ;;  %v2168_v29 = vpop.eup %2167 }
 0x15a   : > { %1868 = vmatmul.mubr.msk.f32.gmra.mrb[20].mxu0 %vm835_vm1, %v833_v10  ;;  %2179 = vrcp.f32 %v732_v19  ;;  %v2170_v37 = vpop.eup %2169  ;;  %v819_v28 = vmul.f32 %v2168_v29, %v2679_v26 }
 0x15b   : > { %1872 = vmatmul.mubr.msk.f32.gmra.mrb[20].mxu1 %vm835_vm1, %v833_v10  ;;  %930 = vmatprep.mubr.f32.mxu0 %v2413_v0  ;;  %2181 = vrcp.f32 %v734_v20  ;;  %v821_v35 = vmul.f32 %v2170_v37, %v2682_v33 }
 0x15c   : > { %1019 = vmatprep.mubr.f32.mxu1 %v2413_v0 }
 0x15e   : > { %1869 = vmatmul.mubr.msk.f32.gmra.mrb[22].mxu0 %vm835_vm1, %v834_v22 }
 0x15f   : > { %1873 = vmatmul.mubr.msk.f32.gmra.mrb[22].mxu1 %vm835_vm1, %v834_v22  ;;  %1090 = vmatprep.mubr.f32.mxu0 %v2413_v0 }
 0x160   : > { %1179 = vmatprep.mubr.f32.mxu1 %v2413_v0  ;;  %v2172_v23 = vpop.eup %2171 }
 0x161   : > { %v2174_v24 = vpop.eup %2173  ;;  %v820_v38 = vmul.f32 %v2172_v23, %v2684_v34 }
 0x162   : > { %v2176_v25 = vpop.eup %2175  ;;  %v822_v56 = vmul.f32 %v2174_v24, %v2687_v42 }
 0x163   : > { %v2178_v39 = vpop.eup %2177  ;;  %v827_v32 = vmul.f32 %v2176_v25, %v2691_v52 }
 0x164   : > { %v2180_v40 = vpop.eup %2179  ;;  %v829_v43 = vmul.f32 %v2178_v39, %v2695_v59 }
 0x165   : > { %v2182_v36 = vpop.eup %2181  ;;  %v1963_v41 = vpack.c.bf16 %v827_v32, %v819_v28  ;;  %v828_v47 = vmul.f32 %v2180_v40, %v2697_v61 }
 0x166   : > { %v1971_v31 = vpack.c.bf16 %v829_v43, %v821_v35  ;;  %v830_v44 = vmul.f32 %v2182_v36, %v2701_v3 }
 0x167   : > { %v1961_v48 = vpack.c.bf16 %v828_v47, %v820_v38 }
 0x168   : > { %v1969_v26 = vpack.c.bf16 %v830_v44, %v822_v56 }
 0x169   : > { %1962 = vmatprep.subr.bf16.mxu0 %v1961_v48 }
 0x16a   : > { %1970 = vmatprep.subr.bf16.mxu1 %v1969_v26  ;;  %1964 = vmatpush1.bf16.msra.mxu0 %v1963_v41 }
 0x16b   : > { %1972 = vmatpush1.bf16.msra.mxu1 %v1971_v31 }
 0x16d   : > { %1874 = vmatmul.mubr.msk.f32.vlgmr.msra.gmra.mrb[24].mxu0 %vm835_vm1, %v2742_v51 }
 0x16e   : > { %1878 = vmatmul.mubr.msk.f32.vlgmr.msra.gmra.mrb[24].mxu1 %vm835_vm1, %v2742_v51  ;;  %1096 = vmatprep.mubr.f32.mxu0 %v2413_v0 }
 0x16f   : > { %1185 = vmatprep.mubr.f32.mxu1 %v2413_v0 }
 0x171   : > { %1875 = vmatmul.mubr.msk.f32.gmra.mrb[26].mxu0 %vm835_vm1, %v2760_v5 }
 0x172   : > { %1879 = vmatmul.mubr.msk.f32.gmra.mrb[26].mxu1 %vm835_vm1, %v2760_v5  ;;  %1102 = vmatprep.mubr.f32.mxu0 %v2413_v0 }
 0x173   : > { %1191 = vmatprep.mubr.f32.mxu1 %v2413_v0 }
 0x175   : > { %1876 = vmatmul.mubr.msk.f32.gmra.mrb[28].mxu0 %vm835_vm1, %v833_v10 }
 0x176   : > { %1880 = vmatmul.mubr.msk.f32.gmra.mrb[28].mxu1 %vm835_vm1, %v833_v10  ;;  %1108 = vmatprep.mubr.f32.mxu0 %v2413_v0 }
 0x177   : > { %1197 = vmatprep.mubr.f32.mxu1 %v2413_v0 }
 0x179   : > { %1877 = vmatmul.mubr.msk.f32.gmra.mrb[30].mxu0 %vm835_vm1, %v834_v22 }
 0x17a   : > { %1881 = vmatmul.mubr.msk.f32.gmra.mrb[30].mxu1 %vm835_vm1, %v834_v22  ;;  %1496 = vmatprep.mubr.f32.mxu0 %v2413_v0 }
 0x17b   : > { %1567 = vmatprep.mubr.f32.mxu1 %v2413_v0 }
 0x225   : > { %v2811_v33 = vpop.f32.mrb[16].mxu0 }
 0x226   : > { %v1882_v34 = vmul.f32 -1.442695, %v2811_v33  ;;  %v2814_v42 = vpop.f32.mrb[16].mxu1  ;;  %v2816_v52 = vpop.f32.mrb[17].mxu0 }
 0x227   : > { %v1884_v59 = vmul.f32 -1.442695, %v2814_v42  ;;  %v1883_v61 = vmul.f32 -1.442695, %v2816_v52  ;;  %v2820_v3 = vpop.f32.mrb[17].mxu1 }
 0x228   : > { %2183 = vpow2.f32 %v1882_v34  ;;  %v1885_v27 = vmul.f32 -1.442695, %v2820_v3 }
 0x229   : > { %2185 = vpow2.f32 %v1884_v59  ;;  %v2823_v57 = vpop.f32.mrb[18].mxu0 }
 0x22a   : > { %2187 = vpow2.f32 %v1883_v61  ;;  %v1890_v46 = vmul.f32 -1.442695, %v2823_v57  ;;  %v2826_v51 = vpop.f32.mrb[18].mxu1  ;;  %v2828_v60 = vpop.f32.mrb[19].mxu0 }
 0x22b   : > { %2189 = vpow2.f32 %v1885_v27  ;;  %v1892_v30 = vmul.f32 -1.442695, %v2826_v51  ;;  %v1891_v50 = vmul.f32 -1.442695, %v2828_v60  ;;  %v2832_v54 = vpop.f32.mrb[19].mxu1 }
 0x22c   : > { %2191 = vpow2.f32 %v1890_v46  ;;  %v1893_v55 = vmul.f32 -1.442695, %v2832_v54 }
 0x22d   : > { %2193 = vpow2.f32 %v1892_v30  ;;  %v2835_v58 = vpop.f32.mrb[20].mxu0 }
 0x22e   : > { %2195 = vpow2.f32 %v1891_v50  ;;  %v1898_v45 = vmul.f32 -1.442695, %v2835_v58  ;;  %v2838_v49 = vpop.f32.mrb[20].mxu1  ;;  %v2840_v62 = vpop.f32.mrb[21].mxu0 }
 0x22f   : > { %2197 = vpow2.f32 %v1893_v55  ;;  %v1900_v53 = vmul.f32 -1.442695, %v2838_v49  ;;  %v1899_v63 = vmul.f32 -1.442695, %v2840_v62  ;;  %v2844_v2 = vpop.f32.mrb[21].mxu1 }
 0x230   : > { %2199 = vpow2.f32 %v1898_v45  ;;  %v1901_v14 = vmul.f32 -1.442695, %v2844_v2 }
 0x231   : > { %2201 = vpow2.f32 %v1900_v53  ;;  %v2847_v1 = vpop.f32.mrb[22].mxu0 }
 0x232   : > { %v2184_v4 = vpop.eup %2183  ;;  %2203 = vpow2.f32 %v1899_v63  ;;  %v1906_v5 = vmul.f32 -1.442695, %v2847_v1  ;;  %v2850_v6 = vpop.f32.mrb[22].mxu1 }
 0x233   : > { %v2852_v17 = vpop.f32.mrb[23].mxu0  ;;  %v2186_v18 = vpop.eup %2185  ;;  %v1300_v9 = vadd.f32 1.0, %v2184_v4  ;;  %2205 = vpow2.f32 %v1901_v14  ;;  %v1908_v36 = vmul.f32 -1.442695, %v2850_v6 }
 0x234   : > { %v2854_v7 = vpop.f32.mrb[23].mxu1  ;;  %v2188_v21 = vpop.eup %2187  ;;  %v1302_v8 = vadd.f32 1.0, %v2186_v18  ;;  %2207 = vpow2.f32 %v1906_v5  ;;  %v1907_v47 = vmul.f32 -1.442695, %v2852_v17 }
 0x235   : > { %v2190_v10 = vpop.eup %2189  ;;  %2209 = vrcp.f32 %v1300_v9  ;;  %v1301_v11 = vadd.f32 1.0, %v2188_v21  ;;  %v1909_v31 = vmul.f32 -1.442695, %v2854_v7 }
 0x236   : > { %v2192_v12 = vpop.eup %2191  ;;  %2211 = vrcp.f32 %v1302_v8  ;;  %v1303_v13 = vadd.f32 1.0, %v2190_v10 }
 0x237   : > { %v2194_v15 = vpop.eup %2193  ;;  %2213 = vrcp.f32 %v1301_v11  ;;  %v1308_v16 = vadd.f32 1.0, %v2192_v12 }
 0x238   : > { %v2196_v19 = vpop.eup %2195  ;;  %2215 = vrcp.f32 %v1303_v13  ;;  %v1310_v20 = vadd.f32 1.0, %v2194_v15 }
 0x239   : > { %v2198_v22 = vpop.eup %2197  ;;  %2217 = vrcp.f32 %v1308_v16  ;;  %v1309_v29 = vadd.f32 1.0, %v2196_v19 }
 0x23a   : > { %v2200_v37 = vpop.eup %2199  ;;  %2219 = vrcp.f32 %v1310_v20  ;;  %v1311_v23 = vadd.f32 1.0, %v2198_v22 }
 0x23b   : > { %v2202_v24 = vpop.eup %2201  ;;  %2221 = vrcp.f32 %v1309_v29  ;;  %v1316_v25 = vadd.f32 1.0, %v2200_v37 }
 0x23c   : > { %v2204_v39 = vpop.eup %2203  ;;  %2223 = vrcp.f32 %v1311_v23  ;;  %v1318_v28 = vadd.f32 1.0, %v2202_v24 }
 0x23d   : > { %v2206_v32 = vpop.eup %2205  ;;  %2225 = vrcp.f32 %v1316_v25  ;;  %v1317_v40 = vadd.f32 1.0, %v2204_v39 }
 0x23e   : > { %v2208_v35 = vpop.eup %2207  ;;  %2227 = vrcp.f32 %v1318_v28  ;;  %v1319_v43 = vadd.f32 1.0, %v2206_v32 }
 0x23f   : > { %v2210_v38 = vpop.eup %2209  ;;  %2229 = vrcp.f32 %v1317_v40  ;;  %v1324_v41 = vadd.f32 1.0, %v2208_v35 }
 0x240   : > { %v2212_v56 = vpop.eup %2211  ;;  %2231 = vrcp.f32 %v1319_v43  ;;  %v2859_v26 = vpop.f32.mrb[24].mxu0  ;;  %v1396_v59 = vmul.f32 %v2210_v38, %v2811_v33 }
 0x241   : > { %v2214_v44 = vpop.eup %2213  ;;  %2233 = vrcp.f32 %v1324_v41  ;;  %v1398_v61 = vmul.f32 %v2212_v56, %v2814_v42  ;;  %v1886_v27 = vmul.f32 -1.442695, %v2859_v26  ;;  %v2864_v46 = vpop.f32.mrb[24].mxu1 }
 0x242   : > { %v2216_v48 = vpop.eup %2215  ;;  %2235 = vpow2.f32 %v1908_v36  ;;  %v2866_v30 = vpop.f32.mrb[25].mxu0  ;;  %v1888_v45 = vmul.f32 -1.442695, %v2864_v46  ;;  %v1397_v42 = vmul.f32 %v2214_v44, %v2816_v52 }
 0x243   : > { %v2218_v34 = vpop.eup %2217  ;;  %2237 = vpow2.f32 %v1907_v47  ;;  %v1887_v53 = vmul.f32 -1.442695, %v2866_v30  ;;  %v2871_v63 = vpop.f32.mrb[25].mxu1  ;;  %v1399_v18 = vmul.f32 %v2216_v48, %v2820_v3 }
 0x244   : > { %v2220_v50 = vpop.eup %2219  ;;  %v1404_v55 = vmul.f32 %v2218_v34, %v2823_v57  ;;  %2239 = vpow2.f32 %v1909_v31  ;;  %v1889_v4 = vmul.f32 -1.442695, %v2871_v63  ;;  %v2878_v21 = vpop.f32.mrb[26].mxu0 }
 0x245   : > { %v2222_v33 = vpop.eup %2221  ;;  %v1406_v14 = vmul.f32 %v2220_v50, %v2826_v51  ;;  %2241 = vpow2.f32 %v1886_v27  ;;  %v1894_v52 = vmul.f32 -1.442695, %v2878_v21  ;;  %v2882_v51 = vpop.f32.mrb[26].mxu1 }
 0x246   : > { %v2224_v5 = vpop.eup %2223  ;;  %v1975_v9 = vpack.c.bf16 %v1404_v55, %v1396_v59  ;;  %v1405_v57 = vmul.f32 %v2222_v33, %v2828_v60  ;;  %2243 = vpow2.f32 %v1888_v45  ;;  %v2884_v12 = vpop.f32.mrb[27].mxu0  ;;  %v1896_v60 = vmul.f32 -1.442695, %v2882_v51 }
 0x247   : > { %v2226_v8 = vpop.eup %2225  ;;  %v1983_v10 = vpack.c.bf16 %v1406_v14, %v1398_v61  ;;  %v1407_v11 = vmul.f32 %v2224_v5, %v2832_v54  ;;  %2245 = vpow2.f32 %v1887_v53  ;;  %v2889_v15 = vpop.f32.mrb[27].mxu1  ;;  %v1895_v54 = vmul.f32 -1.442695, %v2884_v12 }
 0x248   : > { %v2886_v13 = vpop.eup %2227  ;;  %v1973_v3 = vpack.c.bf16 %v1405_v57, %v1397_v42  ;;  %2247 = vpow2.f32 %v1889_v4  ;;  %v1897_v22 = vmul.f32 -1.442695, %v2889_v15  ;;  %v2897_v29 = vpop.f32.mrb[28].mxu0  ;;  %v2905_v28 = vmul.f32 %v2226_v8, %v2835_v58 }
 0x249   : > { %v2891_v16 = vpop.eup %2229  ;;  %v1981_v19 = vpack.c.bf16 %v1407_v11, %v1399_v18  ;;  %2249 = vpow2.f32 %v1894_v52  ;;  %v1902_v23 = vmul.f32 -1.442695, %v2897_v29  ;;  %v2900_v24 = vpop.f32.mrb[28].mxu1 }
 0x24a   : > { %v2894_v20 = vpop.eup %2231  ;;  %2251 = vpow2.f32 %v1896_v60  ;;  %1974 = vmatprep.subr.bf16.mxu0 %v1973_v3  ;;  %v2902_v25 = vpop.f32.mrb[29].mxu0  ;;  %v1904_v40 = vmul.f32 -1.442695, %v2900_v24  ;;  %v1414_v60 = vmul.f32 %v2886_v13, %v2838_v49 }
 0x24b   : > { %v2234_v37 = vpop.eup %2233  ;;  %2253 = vpow2.f32 %v1895_v54  ;;  %1982 = vmatprep.subr.bf16.mxu1 %v1981_v19  ;;  %1976 = vmatpush1.bf16.msra.mxu0 %v1975_v9  ;;  %v2911_v35 = vpop.f32.mrb[29].mxu1 }
 0x24c   : > { %v2236_v39 = vpop.eup %2235  ;;  %v2908_v32 = vmul.f32 %v2234_v37, %v2847_v1  ;;  %2255 = vpow2.f32 %v1897_v22  ;;  %1984 = vmatpush1.bf16.msra.mxu1 %v1983_v10  ;;  %v2915_v58 = vpop.f32.mrb[30].mxu0  ;;  %v1903_v10 = vmul.f32 -1.442695, %v2902_v25  ;;  %v1905_v52 = vmul.f32 -1.442695, %v2911_v35 }
 0x24d   : > { %v2238_v43 = vpop.eup %2237  ;;  %v1326_v36 = vadd.f32 1.0, %v2236_v39  ;;  %2257 = vpow2.f32 %v1902_v23  ;;  %v2917_v31 = vpop.f32.mrb[30].mxu1  ;;  %v1910_v54 = vmul.f32 -1.442695, %v2915_v58  ;;  %v1413_v37 = vmul.f32 %v2891_v16, %v2840_v62 }
 0x24e   : > { %v2240_v38 = vpop.eup %2239  ;;  %v1979_v41 = vpack.c.bf16 %v2908_v32, %v2905_v28  ;;  %v1325_v47 = vadd.f32 1.0, %v2238_v43  ;;  %2259 = vpow2.f32 %v1904_v40  ;;  %v2919_v44 = vpop.f32.mrb[31].mxu0  ;;  %v1415_v23 = vmul.f32 %v2894_v20, %v2844_v2 }
 0x24f   : > { %v2242_v56 = vpop.eup %2241  ;;  %2261 = vrcp.f32 %v1326_v36  ;;  %v1327_v1 = vadd.f32 1.0, %v2240_v38  ;;  %v2921_v59 = vpop.f32.mrb[31].mxu1  ;;  %v1912_v40 = vmul.f32 -1.442695, %v2917_v31  ;;  %v1911_v49 = vmul.f32 -1.442695, %v2919_v44 }
 0x250   : > { %v2244_v48 = vpop.eup %2243  ;;  %2263 = vrcp.f32 %v1325_v47  ;;  %v1304_v34 = vadd.f32 1.0, %v2242_v56  ;;  %v1913_v47 = vmul.f32 -1.442695, %v2921_v59 }
 0x251   : > { %v2246_v61 = vpop.eup %2245  ;;  %2265 = vrcp.f32 %v1327_v1  ;;  %v1306_v27 = vadd.f32 1.0, %v2244_v48 }
 0x252   : > { %v2248_v50 = vpop.eup %2247  ;;  %2267 = vrcp.f32 %v1304_v34  ;;  %v1305_v55 = vadd.f32 1.0, %v2246_v61 }
 0x253   : > { %v2250_v45 = vpop.eup %2249  ;;  %2269 = vrcp.f32 %v1306_v27  ;;  %v1307_v53 = vadd.f32 1.0, %v2248_v50 }
 0x254   : > { %v2252_v33 = vpop.eup %2251  ;;  %2271 = vrcp.f32 %v1305_v55  ;;  %v1312_v42 = vadd.f32 1.0, %v2250_v45 }
 0x255   : > { %v2254_v14 = vpop.eup %2253  ;;  %2273 = vrcp.f32 %v1307_v53  ;;  %v1314_v4 = vadd.f32 1.0, %v2252_v33 }
 0x256   : > { %v2256_v5 = vpop.eup %2255  ;;  %2275 = vrcp.f32 %v1312_v42  ;;  %v1313_v18 = vadd.f32 1.0, %v2254_v14 }
 0x257   : > { %v2258_v9 = vpop.eup %2257  ;;  %2277 = vrcp.f32 %v1314_v4  ;;  %v1315_v57 = vadd.f32 1.0, %v2256_v5 }
 0x258   : > { %v2260_v8 = vpop.eup %2259  ;;  %2279 = vrcp.f32 %v1313_v18  ;;  %v1320_v50 = vadd.f32 1.0, %v2258_v9 }
 0x259   : > { %v2262_v11 = vpop.eup %2261  ;;  %2281 = vrcp.f32 %v1315_v57  ;;  %v1322_v45 = vadd.f32 1.0, %v2260_v8 }
 0x25a   : > { %v2264_v3 = vpop.eup %2263  ;;  %v1422_v19 = vmul.f32 %v2262_v11, %v2850_v6  ;;  %2283 = vpow2.f32 %v1903_v10 }
 0x25b   : > { %v2266_v22 = vpop.eup %2265  ;;  %v1421_v39 = vmul.f32 %v2264_v3, %v2852_v17  ;;  %2285 = vpow2.f32 %v1905_v52 }
 0x25c   : > { %v2268_v43 = vpop.eup %2267  ;;  %v1987_v36 = vpack.c.bf16 %v1422_v19, %v1414_v60  ;;  %v1423_v38 = vmul.f32 %v2266_v22, %v2854_v7  ;;  %2287 = vpow2.f32 %v1910_v54  ;;  %v2944_v7 = vld [vmem:[%s3024_s3] sm:$0xff] }
 0x25d   : > { %v2270_v6 = vpop.eup %2269  ;;  %v1977_v13 = vpack.c.bf16 %v1421_v39, %v1413_v37  ;;  %2289 = vpow2.f32 %v1912_v40  ;;  %v1400_v56 = vmul.f32 %v2268_v43, %v2859_v26 }
 0x25e   : > { %v2272_v62 = vpop.eup %2271  ;;  %v1985_v16 = vpack.c.bf16 %v1423_v38, %v1415_v23  ;;  %2291 = vpow2.f32 %v1911_v49  ;;  %v1402_v34 = vmul.f32 %v2270_v6, %v2864_v46 }
 0x25f   : > { %v2274_v2 = vpop.eup %2273  ;;  %1978 = vmatprep.subr.bf16.mxu0 %v1977_v13  ;;  %2293 = vpow2.f32 %v1913_v47  ;;  %v1401_v28 = vmul.f32 %v2272_v62, %v2866_v30 }
 0x260   : > { %v2276_v17 = vpop.eup %2275  ;;  %1986 = vmatprep.subr.bf16.mxu1 %v1985_v16  ;;  %1980 = vmatpush1.bf16.msra.mxu0 %v1979_v41  ;;  %v1403_v26 = vmul.f32 %v2274_v2, %v2871_v63  ;;  %2295 = vrcp.f32 %v1320_v50 }
 0x261   : > { %v2278_v20 = vpop.eup %2277  ;;  %v1408_v1 = vmul.f32 %v2276_v17, %v2878_v21  ;;  %1988 = vmatpush1.bf16.msra.mxu1 %v1987_v36  ;;  %2297 = vrcp.f32 %v1322_v45 }
 0x262   : > { %v2280_v48 = vpop.eup %2279  ;;  %v1410_v61 = vmul.f32 %v2278_v20, %v2882_v51 }
 0x263   : > { %v2282_v27 = vpop.eup %2281  ;;  %v1991_v32 = vpack.c.bf16 %v1408_v1, %v1400_v56  ;;  %v1409_v41 = vmul.f32 %v2280_v48, %v2884_v12  ;;  %1914 = vmatmul.mubr.msk.f32.vlgmr.msra.gmra.mrb[32].mxu0 %vm835_vm1, %v2944_v7 }
 0x264   : > { %v1999_v21 = vpack.c.bf16 %v1410_v61, %v1402_v34  ;;  %v1411_v55 = vmul.f32 %v2282_v27, %v2889_v15  ;;  %1915 = vmatmul.mubr.msk.f32.vlgmr.msra.gmra.mrb[32].mxu1 %vm835_vm1, %v2944_v7  ;;  %1638 = vmatprep.mubr.f32.mxu0 %v2413_v0  ;;  %v2284_v30 = vpop.eup %2283 }
 0x265   : > { %v1989_v46 = vpack.c.bf16 %v1409_v41, %v1401_v28  ;;  %1709 = vmatprep.mubr.f32.mxu1 %v2413_v0  ;;  %v2286_v12 = vpop.eup %2285  ;;  %v1321_v53 = vadd.f32 1.0, %v2284_v30 }
 0x266   : > { %v1997_v51 = vpack.c.bf16 %v1411_v55, %v1403_v26  ;;  %v2288_v33 = vpop.eup %2287  ;;  %v1323_v63 = vadd.f32 1.0, %v2286_v12 }
 0x267   : > { %1990 = vmatprep.subr.bf16.mxu0 %v1989_v46  ;;  %v2290_v15 = vpop.eup %2289  ;;  %2299 = vrcp.f32 %v1321_v53  ;;  %v1328_v42 = vadd.f32 1.0, %v2288_v33 }
 0x268   : > { %1998 = vmatprep.subr.bf16.mxu1 %v1997_v51  ;;  %1992 = vmatpush1.bf16.msra.mxu0 %v1991_v32  ;;  %v2292_v14 = vpop.eup %2291  ;;  %2301 = vrcp.f32 %v1323_v63  ;;  %v1330_v4 = vadd.f32 1.0, %v2290_v15 }
 0x269   : > { %2000 = vmatpush1.bf16.msra.mxu1 %v1999_v21  ;;  %v2294_v5 = vpop.eup %2293  ;;  %2303 = vrcp.f32 %v1328_v42  ;;  %v1329_v0 = vadd.f32 1.0, %v2292_v14 }
 0x26a   : > { %2305 = vrcp.f32 %v1330_v4  ;;  %v1331_v18 = vadd.f32 1.0, %v2294_v5  ;;  %v2296_v9 = vpop.eup %2295 }
 0x26b   : > { %2307 = vrcp.f32 %v1329_v0  ;;  %v2298_v57 = vpop.eup %2297  ;;  %v1416_v3 = vmul.f32 %v2296_v9, %v2897_v29 }
 0x26c   : > { %2309 = vrcp.f32 %v1331_v18  ;;  %v1418_v54 = vmul.f32 %v2298_v57, %v2900_v24 }
 0x271   : > { %v2300_v8 = vpop.eup %2299 }
 0x272   : > { %v2302_v10 = vpop.eup %2301  ;;  %v1417_v23 = vmul.f32 %v2300_v8, %v2902_v25 }
 0x273   : > { %v2304_v11 = vpop.eup %2303  ;;  %v1419_v43 = vmul.f32 %v2302_v10, %v2911_v35 }
 0x274   : > { %v2306_v52 = vpop.eup %2305  ;;  %v1424_v60 = vmul.f32 %v2304_v11, %v2915_v58 }
 0x275   : > { %v2308_v19 = vpop.eup %2307  ;;  %v1426_v22 = vmul.f32 %v2306_v52, %v2917_v31 }
 0x276   : > { %v2310_v37 = vpop.eup %2309  ;;  %v1995_v39 = vpack.c.bf16 %v1424_v60, %v1416_v3  ;;  %v1425_v40 = vmul.f32 %v2308_v19, %v2919_v44 }
 0x277   : > { %v2003_v36 = vpack.c.bf16 %v1426_v22, %v1418_v54  ;;  %v1427_v38 = vmul.f32 %v2310_v37, %v2921_v59 }
 0x278   : > { %v1993_v29 = vpack.c.bf16 %v1425_v40, %v1417_v23 }
 0x279   : > { %v2001_v49 = vpack.c.bf16 %v1427_v38, %v1419_v43 }
 0x27a   : > { %1994 = vmatprep.subr.bf16.mxu0 %v1993_v29 }
 0x27b   : > { %2002 = vmatprep.subr.bf16.mxu1 %v2001_v49  ;;  %1996 = vmatpush1.bf16.msra.mxu0 %v1995_v39 }
 0x27c   : > { %2004 = vmatpush1.bf16.msra.mxu1 %v2003_v36 }
 0x27e   : > { %1916 = vmatmul.mubr.msk.f32.vlgmr.msra.gmra.mrb[34].mxu0 %vm835_vm1, %v2944_v7 }
 0x27f   : > { %1917 = vmatmul.mubr.msk.f32.vlgmr.msra.gmra.mrb[34].mxu1 %vm835_vm1, %v2944_v7 }
 0x336   : > { %v1498_v24 = vpop.f32.mrb[32].mxu0 }
 0x337   : > { %1716 = vst [vmem:[%s215_s11] sm:$0xff] %v1498_v24  ;;  %v1569_v25 = vpop.f32.mrb[32].mxu1  ;;  %v1500_v35 = vpop.f32.mrb[33].mxu0 }
 0x338   : > { %1718 = vst [vmem:[%s215_s11 + $0x10] sm:$0xff] %v1569_v25  ;;  %1717 = vst [vmem:[%s215_s11 + $0x8] sm:$0xff] %v1500_v35  ;;  %v1571_v58 = vpop.f32.mrb[33].mxu1 }
 0x339   : > { %1719 = vst [vmem:[%s215_s11 + $0x18] sm:$0xff] %v1571_v58 }
 0x351   : > { %v1640_v31 = vpop.f32.mrb[34].mxu0 }
 0x352   : > { %1720 = vst [vmem:[%s215_s11 + $0x20] sm:$0xff] %v1640_v31  ;;  %v1711_v44 = vpop.f32.mrb[34].mxu1  ;;  %v1642_v59 = vpop.f32.mrb[35].mxu0 }
 0x353   : > { %1722 = vst [vmem:[%s215_s11 + $0x30] sm:$0xff] %v1711_v44  ;;  %1721 = vst [vmem:[%s215_s11 + $0x28] sm:$0xff] %v1642_v59  ;;  %v1713_v6 = vpop.f32.mrb[35].mxu1 }
 0x354   : > { %1723 = vst [vmem:[%s215_s11 + $0x38] sm:$0xff] %v1713_v6 }
 0x355   : > { %2354 = shalt.err (!%p2351_p3)
}
 0x356   : > { %s2355_s14 = scalar_lea.hbm %s2977_s5, 1024  ;;  %s2359_s23 = scalar_lea.hbm %s3025_s4, 2048 }
 0x357   : > { %p2356_p5 = scmp.ne.s32.totalorder %s2977_s5, %s2355_s14  ;;  %p2360_p9 = scmp.lt.u32.totalorder %s2977_s5, %s3025_s4 }
 0x358   : > { %p2361_p0 = scmp.lt.u32.totalorder %s2359_s23, %s2355_s14  ;;  %p2363_p6 = scmp.lt.u32.totalorder %s2355_s14, %s2977_s5 }
 0x359   : > { %p2357_p7 = pnand %p2356_p5, %p3033_p11 }
 0x35a   : > { %p2362_p2 = por %p2361_p0, %p2360_p9 }
 0x35b   : > { %p2358_p8 = pneg %p2357_p7 }
 0x35c   : > { %p2364_p12 = por %p2363_p6, %p2362_p2 }
 0x35e   : > { %p2365_p13 = pnand %p2364_p12, %p2358_p8 }
 0x360   : > { %2368 = shalt.err (!%p2365_p13)
}
 0x361   : > { %2007 = dma.vmem_to_hbm [thread:$0]  (%p3033_p11), %s2979_s25, 1024, %s2977_s5, %s1725_s19  }
 0x362 PF: > { %s1751_s10 = sand.u32 1, %s2395_s15   ;;  %p3034_p4 = scmp.ne.s32.totalorder %s3030_s28, 0 }
 0x363   : > { %p3035_p10 = scmp.ge.s32.totalorder %s2407_s18, 2  ;;  %s1752_s11 = scalar_lea.sflag [#allocation4], %s1751_s10 }
 0x365   : > { %p2014_p1 = pnand %p3035_p10, %p3034_p4 }
 0x367   : > { %2390 = dma.done.wait (!%p2014_p1), %s1752_s11, 1024  }
 0x368   : > { %2392 = vsyncadd (!%p2014_p1), %s1752_s11, 4294966272  ;;  %p17_p3 = scmp.ge.s32.totalorder %s2465_s21, 4   ;;  %s3036_s15 = smov %s2399_s16 }
 0x369   : > { %s3037_s16 = smov %s2403_s17  ;;  %s3038_s17 = smov %s2477_s24 }
 0x36a   : > { %s3039_s18 = smov %s2465_s21  ;;  %19 = sbr.rel (!%p17_p3) target bundleno = 5 (0x5), region = 81 }
 0x371   :  { %1757 = vsyncpa [#allocation3], 1 }
 0x372   :  { %1759 = vsyncpa [#allocation3 + $0x1], 1 }
 0x373   :  { %1760 = vsyncpa [#allocation4], 1 }
 0x374   :  { %1762 = vsyncpa [#allocation4 + $0x1], 1 }

</bundles_post_ra>
